<compile_context>
chip_gen: v6e
topology: v6e:2x2x1
jax: 0.10.0
libtpu: 0.0.40
codegen_flags: <defaults>
</compile_context>

<pallas_src>
import functools

import jax
import jax.numpy as jnp
from jax.experimental import pallas as pl
from jax.experimental.pallas import tpu as pltpu

LANE = 128


def _round_up(x, m):
    return (x + m - 1) // m * m


# ---------------------------------------------------------------------------
# Fused kernel (2-phase grid: phase 0 = MLP + running min, phase 1 = epilogue)
# ---------------------------------------------------------------------------
def _fused_kernel(x_ref, wh_ref, wb_ref, b_ref, mask_ref, out_ref,
                  acts_ref, min_ref, *, batch, out_channel, bt):
    """Fused forward for one (phase, batch-tile) grid step.

    x_ref    : (Bt, Kp)     bf16  concat(obs, obs2, obs3), zero padded
    wh_ref   : (Kp, F)      bf16  block-diagonal fused head weight
    wb_ref   : (3, F, F)    bf16  body0 / body1 / tail weights (zero padded)
    b_ref    : (4, 1, F)    f32   head / body0 / body1 / tail biases
    mask_ref : (Bt, F)      f32   action mask (zero padded)
    out_ref  : (Bt, F)      f32   final actions (padded layout)
    acts_ref : (nt, Bt, F)  f32   VMEM scratch: raw tail activations
    min_ref  : (1,)         f32   SMEM scratch: running global min
    """
    phase = pl.program_id(0)
    i = pl.program_id(1)

    BIG = jnp.float32(3.0e38)  # "+inf" stand-in for the masked min

    @pl.when(jnp.logical_and(phase == 0, i == 0))
    def _init():
        min_ref[0] = BIG

    @pl.when(phase == 0)
    def _mlp():
        # Fused heads == relu(cat(head1(obs), head2(obs2), head3(obs3)))
        h = jnp.dot(x_ref[...], wh_ref[...],
                    preferred_element_type=jnp.float32) + b_ref[0]
        h = jnp.maximum(h, 0.0)

        # body: Linear(96,64)+ReLU, Linear(64,32)+ReLU ; tail: Linear(32,out)
        for layer in range(3):
            h = jnp.dot(h.astype(jnp.bfloat16), wb_ref[layer],
                        preferred_element_type=jnp.float32) + b_ref[layer + 1]
            if layer < 2:
                h = jnp.maximum(h, 0.0)

        acts_ref[i] = h

        # Running global min restricted to the REAL (batch, out_channel)
        # region (padded rows/lanes excluded) -- matches torch's actions.min().
        rows = jax.lax.broadcasted_iota(jnp.int32, h.shape, 0) + i * bt
        cols = jax.lax.broadcasted_iota(jnp.int32, h.shape, 1)
        valid = jnp.logical_and(rows < batch, cols < out_channel)
        tile_min = jnp.min(jnp.where(valid, h, BIG))
        min_ref[0] = jnp.minimum(min_ref[0], tile_min)

    @pl.when(phase == 1)
    def _epilogue():
        out_ref[...] = (acts_ref[i] - min_ref[0] + 1.0) * mask_ref[...]


# ---------------------------------------------------------------------------
# Parameter construction / packing (wrapper-side layout plumbing)
# ---------------------------------------------------------------------------
def init_params(key, in_channel, out_channel, extension=2):
    """Deterministic synthetic init; weights stored (in, out), biases (1, out)."""
    def linear_params(k, fan_in, fan_out):
        kw, kb = jax.random.split(k)
        bound = 1.0 / (fan_in ** 0.5)
        w = jax.random.uniform(kw, (fan_in, fan_out), jnp.float32, -bound, bound)
        b = jax.random.uniform(kb, (1, fan_out), jnp.float32, -bound, bound)
        return w, b

    keys = jax.random.split(key, 6)
    p = {}
    p["w1"], p["b1"] = linear_params(keys[0], in_channel, 32)
    p["w2"], p["b2"] = linear_params(keys[1], in_channel, 32)
    p["w3"], p["b3"] = linear_params(keys[2], in_channel, 32)
    # body from _body_layers(layers=4, extension=2): Linear(96,64), Linear(64,32)
    p["wb0"], p["bb0"] = linear_params(keys[3], 96, 32 * extension)
    p["wb1"], p["bb1"] = linear_params(keys[4], 32 * extension, 32)
    p["wt"], p["bt"] = linear_params(keys[5], 32, out_channel)
    return p


def pack_params(p, in_channel, out_channel):
    """Pack weights into lane-dense, stacked buffers (few big DMAs)."""
    k_cat = 3 * in_channel
    kp = _round_up(k_cat, LANE)                     # fused-head input width
    f = _round_up(max(96, out_channel), LANE)       # common hidden/output width

    def pad2(w, rows, cols):
        r, c = w.shape
        return jnp.pad(w, ((0, rows - r), (0, cols - c)))

    # Block-diagonal fused head weight: output == cat of the 3 head outputs.
    w_head = jnp.zeros((k_cat, 96), jnp.float32)
    w_head = w_head.at[0 * in_channel:1 * in_channel, 0:32].set(p["w1"])
    w_head = w_head.at[1 * in_channel:2 * in_channel, 32:64].set(p["w2"])
    w_head = w_head.at[2 * in_channel:3 * in_channel, 64:96].set(p["w3"])
    b_head = jnp.concatenate([p["b1"], p["b2"], p["b3"]], axis=1)    # (1, 96)

    wh = pad2(w_head, kp, f).astype(jnp.bfloat16)                    # (Kp, F)
    wb = jnp.stack([pad2(p["wb0"], f, f),
                    pad2(p["wb1"], f, f),
                    pad2(p["wt"], f, f)]).astype(jnp.bfloat16)       # (3, F, F)
    bs = jnp.stack([pad2(b_head, 1, f),
                    pad2(p["bb0"], 1, f),
                    pad2(p["bb1"], 1, f),
                    pad2(p["bt"], 1, f)])                            # (4, 1, F)
    return {"wh": wh, "wb": wb, "bs": bs}


# ---------------------------------------------------------------------------
# Forward
# ---------------------------------------------------------------------------
@jax.jit
def network_forward(obs, obs2, obs3, mask, packed):
    B = obs.shape[0]
    out_channel = mask.shape[1]
    wh, wb, bs = packed["wh"], packed["wb"], packed["bs"]
    kp, f = wh.shape

    # Batch tile: <=512 rows, multiple of 8 sublanes; pad B to whole tiles.
    bt = min(512, _round_up(B, 8))
    bp = _round_up(B, bt)
    nt = bp // bt

    # Lane-dense, batch-padded inputs.
    x_cat = jnp.concatenate([obs, obs2, obs3], axis=1)               # (B, 3*in)
    x_cat = jnp.pad(x_cat, ((0, bp - B), (0, kp - x_cat.shape[1])))
    x_cat = x_cat.astype(jnp.bfloat16)
    mask_p = jnp.pad(mask.astype(jnp.float32),
                     ((0, bp - B), (0, f - out_channel)))

    kernel = functools.partial(_fused_kernel,
                               batch=B, out_channel=out_channel, bt=bt)

    out = pl.pallas_call(
        kernel,
        out_shape=jax.ShapeDtypeStruct((bp, f), jnp.float32),
        grid=(2, nt),                                   # (phase, batch tile)
        in_specs=[
            # activations: streamed per tile in phase 0, parked in phase 1
            pl.BlockSpec((bt, kp), lambda p, i: (i * (1 - p), 0)),
            pl.BlockSpec((kp, f), lambda p, i: (0, 0)),         # fused head W (resident)
            pl.BlockSpec((3, f, f), lambda p, i: (0, 0, 0)),    # body+tail W (resident)
            pl.BlockSpec((4, 1, f), lambda p, i: (0, 0, 0)),    # biases (resident)
            # mask: only consumed in phase 1
            pl.BlockSpec((bt, f), lambda p, i: (i * p, 0)),
        ],
        # output only written in phase 1; keep block index pinned during phase 0
        out_specs=pl.BlockSpec((bt, f), lambda p, i: (i * p, 0)),
        scratch_shapes=[
            pltpu.VMEM((nt, bt, f), jnp.float32),   # raw tail activations
            pltpu.SMEM((1,), jnp.float32),          # running global min
        ],
        compiler_params=pltpu.CompilerParams(
            dimension_semantics=("arbitrary", "arbitrary")),
    )(x_cat, wh, wb, bs, mask_p)

    # TODO(synk): torch's `print(actions.data)` side-effect omitted (no clean
    # full-tensor debug print from a TPU kernel).
    return out[:B, :out_channel]


# ---------------------------------------------------------------------------
# Reference (mirrors the PyTorch module)
# ---------------------------------------------------------------------------
def reference_forward(obs, obs2, obs3, mask, p, bf16_matmul=False):
    def lin(x, w, b):
        if bf16_matmul:
            x = x.astype(jnp.bfloat16)
            w = w.astype(jnp.bfloat16)
        return jnp.dot(x, w, preferred_element_type=jnp.float32) + b

    relu = lambda t: jnp.maximum(t, 0.0)
    h1 = relu(lin(obs, p["w1"], p["b1"]))
    h2 = relu(lin(obs2, p["w2"], p["b2"]))
    h3 = relu(lin(obs3, p["w3"], p["b3"]))
    f1 = jnp.concatenate([h1, h2, h3], axis=1)
    f2 = relu(lin(f1, p["wb0"], p["bb0"]))
    f2 = relu(lin(f2, p["wb1"], p["bb1"]))
    a = lin(f2, p["wt"], p["bt"])
    a = a - jnp.min(a) + 1.0
    return a * mask


if __name__ == "__main__":
    B, in_channel, out_channel = 2, 4, 8

    key = jax.random.PRNGKey(0)
    k_obs, k_obs2, k_obs3, k_mask, k_params = jax.random.split(key, 5)

    obs = jax.random.normal(k_obs, (B, in_channel), jnp.float32)
    obs2 = jax.random.normal(k_obs2, (B, in_channel), jnp.float32)
    obs3 = jax.random.normal(k_obs3, (B, in_channel), jnp.float32)
    mask = jax.random.bernoulli(k_mask, 0.7, (B, out_channel)).astype(jnp.float32)

    params = init_params(k_params, in_channel, out_channel)
    packed = pack_params(params, in_channel, out_channel)

    actions = network_forward(obs, obs2, obs3, mask, packed)
    actions = jax.block_until_ready(actions)

    ref_bf16 = reference_forward(obs, obs2, obs3, mask, params, bf16_matmul=True)
    ref_f32 = reference_forward(obs, obs2, obs3, mask, params, bf16_matmul=False)

    assert actions.shape == (B, out_channel)
    # Tight check against a reference with identical (bf16-matmul) numerics.
    assert jnp.allclose(actions, ref_bf16, atol=1e-4, rtol=1e-4), "mismatch vs bf16 reference"
    # Looser sanity check against the full-f32 (torch-exact) reference.
    assert jnp.allclose(actions, ref_f32, atol=1e-1, rtol=1e-1), "mismatch vs f32 reference"

    print("KERNEL_OK")
</pallas_src>

<mosaic_0001>
module attributes {stable_mosaic.version = 11 : i64} {
  func.func @_fused_kernel(%arg0: i32, %arg1: i32, %arg2: memref<8x128xbf16, #tpu.memory_space<vmem>>, %arg3: memref<128x128xbf16, #tpu.memory_space<vmem>>, %arg4: memref<3x128x128xbf16, #tpu.memory_space<vmem>>, %arg5: memref<4x1x128xf32, #tpu.memory_space<vmem>>, %arg6: memref<8x128xf32, #tpu.memory_space<vmem>>, %arg7: memref<8x128xf32, #tpu.memory_space<vmem>>, %arg8: memref<1x8x128xf32, #tpu.memory_space<vmem>>, %arg9: memref<1xf32, #tpu.memory_space<smem>>) attributes {dimension_semantics = [#tpu.dimension_semantics<arbitrary>, #tpu.dimension_semantics<arbitrary>], iteration_bounds = array<i64: 2, 1>, scalar_prefetch = 0 : i64, scratch_operands = 2 : i64, tpu.core_type = #tpu.core_type<tc>, window_params = [{transform_indices = @transform_0, window_bounds = array<i64: 8, 128>}, {pipeline_mode = #tpu.pipeline_mode<synchronous>, transform_indices = @transform_1, window_bounds = array<i64: 128, 128>}, {pipeline_mode = #tpu.pipeline_mode<synchronous>, transform_indices = @transform_2, window_bounds = array<i64: 3, 128, 128>}, {pipeline_mode = #tpu.pipeline_mode<synchronous>, transform_indices = @transform_3, window_bounds = array<i64: 4, 1, 128>}, {transform_indices = @transform_4, window_bounds = array<i64: 8, 128>}, {transform_indices = @transform_5, window_bounds = array<i64: 8, 128>}]} {
    %c0_i32 = arith.constant 0 : i32
    %0 = arith.cmpi eq, %arg0, %c0_i32 : i32
    %c0_i32_0 = arith.constant 0 : i32
    %1 = arith.cmpi eq, %arg1, %c0_i32_0 : i32
    %2 = arith.andi %0, %1 : i1
    %3 = arith.extui %2 : i1 to i32
    %cst = arith.constant 3.000000e+38 : f32
    %c0_i32_1 = arith.constant 0 : i32
    %4 = arith.cmpi ne, %3, %c0_i32_1 : i32
    scf.if %4 {
      %c0 = arith.constant 0 : index
      %11 = memref.load %arg9[%c0] : memref<1xf32, #tpu.memory_space<smem>>
      memref.store %cst, %arg9[%c0] : memref<1xf32, #tpu.memory_space<smem>>
    } else {
    }
    %c0_i32_2 = arith.constant 0 : i32
    %5 = arith.cmpi eq, %arg0, %c0_i32_2 : i32
    %6 = arith.extui %5 : i1 to i32
    %cst_3 = arith.constant 3.000000e+38 : f32
    %c0_i32_4 = arith.constant 0 : i32
    %7 = arith.cmpi ne, %6, %c0_i32_4 : i32
    scf.if %7 {
      %c0 = arith.constant 0 : index
      %c0_6 = arith.constant 0 : index
      %11 = vector.load %arg2[%c0, %c0_6] : memref<8x128xbf16, #tpu.memory_space<vmem>>, vector<8x128xbf16>
      %c0_7 = arith.constant 0 : index
      %c0_8 = arith.constant 0 : index
      %12 = vector.load %arg3[%c0_7, %c0_8] : memref<128x128xbf16, #tpu.memory_space<vmem>>, vector<128x128xbf16>
      %cst_9 = arith.constant dense<0.000000e+00> : vector<8x128xf32>
      %13 = tpu.matmul %11, %12, %cst_9 {dimension_numbers = #tpu.dot_dimension_numbers<[1], [0], [0], [1], [0, 0, 1, 1], [], []>} : vector<8x128xbf16>, vector<128x128xbf16>, vector<8x128xf32> -> vector<8x128xf32>
      %c0_10 = arith.constant 0 : index
      %c0_11 = arith.constant 0 : index
      %c0_12 = arith.constant 0 : index
      %14 = vector.load %arg5[%c0_10, %c0_11, %c0_12] : memref<4x1x128xf32, #tpu.memory_space<vmem>>, vector<1x1x128xf32>
      %15 = vector.shape_cast %14 : vector<1x1x128xf32> to vector<1x128xf32>
      %16 = vector.broadcast %15 : vector<1x128xf32> to vector<8x128xf32>
      %17 = arith.addf %13, %16 : vector<8x128xf32>
      %cst_13 = arith.constant 0.000000e+00 : f32
      %18 = vector.broadcast %cst_13 : f32 to vector<8x128xf32>
      %19 = arith.maximumf %17, %18 : vector<8x128xf32>
      %20 = arith.truncf %19 : vector<8x128xf32> to vector<8x128xbf16>
      %c0_14 = arith.constant 0 : index
      %c0_15 = arith.constant 0 : index
      %c0_16 = arith.constant 0 : index
      %21 = vector.load %arg4[%c0_14, %c0_15, %c0_16] : memref<3x128x128xbf16, #tpu.memory_space<vmem>>, vector<1x128x128xbf16>
      %22 = vector.shape_cast %21 : vector<1x128x128xbf16> to vector<128x128xbf16>
      %cst_17 = arith.constant dense<0.000000e+00> : vector<8x128xf32>
      %23 = tpu.matmul %20, %22, %cst_17 {dimension_numbers = #tpu.dot_dimension_numbers<[1], [0], [0], [1], [0, 0, 1, 1], [], []>} : vector<8x128xbf16>, vector<128x128xbf16>, vector<8x128xf32> -> vector<8x128xf32>
      %c1 = arith.constant 1 : index
      %c0_18 = arith.constant 0 : index
      %c0_19 = arith.constant 0 : index
      %24 = vector.load %arg5[%c1, %c0_18, %c0_19] : memref<4x1x128xf32, #tpu.memory_space<vmem>>, vector<1x1x128xf32>
      %25 = vector.shape_cast %24 : vector<1x1x128xf32> to vector<1x128xf32>
      %26 = vector.broadcast %25 : vector<1x128xf32> to vector<8x128xf32>
      %27 = arith.addf %23, %26 : vector<8x128xf32>
      %cst_20 = arith.constant 0.000000e+00 : f32
      %28 = vector.broadcast %cst_20 : f32 to vector<8x128xf32>
      %29 = arith.maximumf %27, %28 : vector<8x128xf32>
      %30 = arith.truncf %29 : vector<8x128xf32> to vector<8x128xbf16>
      %c1_21 = arith.constant 1 : index
      %c0_22 = arith.constant 0 : index
      %c0_23 = arith.constant 0 : index
      %31 = vector.load %arg4[%c1_21, %c0_22, %c0_23] : memref<3x128x128xbf16, #tpu.memory_space<vmem>>, vector<1x128x128xbf16>
      %32 = vector.shape_cast %31 : vector<1x128x128xbf16> to vector<128x128xbf16>
      %cst_24 = arith.constant dense<0.000000e+00> : vector<8x128xf32>
      %33 = tpu.matmul %30, %32, %cst_24 {dimension_numbers = #tpu.dot_dimension_numbers<[1], [0], [0], [1], [0, 0, 1, 1], [], []>} : vector<8x128xbf16>, vector<128x128xbf16>, vector<8x128xf32> -> vector<8x128xf32>
      %c2 = arith.constant 2 : index
      %c0_25 = arith.constant 0 : index
      %c0_26 = arith.constant 0 : index
      %34 = vector.load %arg5[%c2, %c0_25, %c0_26] : memref<4x1x128xf32, #tpu.memory_space<vmem>>, vector<1x1x128xf32>
      %35 = vector.shape_cast %34 : vector<1x1x128xf32> to vector<1x128xf32>
      %36 = vector.broadcast %35 : vector<1x128xf32> to vector<8x128xf32>
      %37 = arith.addf %33, %36 : vector<8x128xf32>
      %cst_27 = arith.constant 0.000000e+00 : f32
      %38 = vector.broadcast %cst_27 : f32 to vector<8x128xf32>
      %39 = arith.maximumf %37, %38 : vector<8x128xf32>
      %40 = arith.truncf %39 : vector<8x128xf32> to vector<8x128xbf16>
      %c2_28 = arith.constant 2 : index
      %c0_29 = arith.constant 0 : index
      %c0_30 = arith.constant 0 : index
      %41 = vector.load %arg4[%c2_28, %c0_29, %c0_30] : memref<3x128x128xbf16, #tpu.memory_space<vmem>>, vector<1x128x128xbf16>
      %42 = vector.shape_cast %41 : vector<1x128x128xbf16> to vector<128x128xbf16>
      %cst_31 = arith.constant dense<0.000000e+00> : vector<8x128xf32>
      %43 = tpu.matmul %40, %42, %cst_31 {dimension_numbers = #tpu.dot_dimension_numbers<[1], [0], [0], [1], [0, 0, 1, 1], [], []>} : vector<8x128xbf16>, vector<128x128xbf16>, vector<8x128xf32> -> vector<8x128xf32>
      %c3 = arith.constant 3 : index
      %c0_32 = arith.constant 0 : index
      %c0_33 = arith.constant 0 : index
      %44 = vector.load %arg5[%c3, %c0_32, %c0_33] : memref<4x1x128xf32, #tpu.memory_space<vmem>>, vector<1x1x128xf32>
      %45 = vector.shape_cast %44 : vector<1x1x128xf32> to vector<1x128xf32>
      %46 = vector.broadcast %45 : vector<1x128xf32> to vector<8x128xf32>
      %47 = arith.addf %43, %46 : vector<8x128xf32>
      %48 = arith.index_cast %arg1 : i32 to index
      %c0_34 = arith.constant 0 : index
      %c0_35 = arith.constant 0 : index
      %49 = vector.load %arg8[%48, %c0_34, %c0_35] : memref<1x8x128xf32, #tpu.memory_space<vmem>>, vector<1x8x128xf32>
      %50 = vector.shape_cast %49 : vector<1x8x128xf32> to vector<8x128xf32>
      %51 = vector.shape_cast %47 : vector<8x128xf32> to vector<1x8x128xf32>
      tpu.vector_store %arg8[%48, %c0_34, %c0_35], %51 {strides = array<i32>} : memref<1x8x128xf32, #tpu.memory_space<vmem>>, vector<1x8x128xf32>,
      %52 = tpu.iota {dimensions = array<i32: 0>} : vector<8x128xi32>
      %c8_i32 = arith.constant 8 : i32
      %53 = arith.muli %arg1, %c8_i32 : i32
      %54 = vector.broadcast %53 : i32 to vector<8x128xi32>
      %55 = arith.addi %52, %54 : vector<8x128xi32>
      %56 = tpu.iota {dimensions = array<i32: 1>} : vector<8x128xi32>
      %c2_i32 = arith.constant 2 : i32
      %57 = vector.broadcast %c2_i32 : i32 to vector<8x128xi32>
      %58 = arith.cmpi slt, %55, %57 : vector<8x128xi32>
      %c8_i32_36 = arith.constant 8 : i32
      %59 = vector.broadcast %c8_i32_36 : i32 to vector<8x128xi32>
      %60 = arith.cmpi slt, %56, %59 : vector<8x128xi32>
      %61 = arith.andi %58, %60 : vector<8x128xi1>
      %62 = vector.broadcast %cst_3 : f32 to vector<8x128xf32>
      %63 = arith.select %61, %47, %62 : vector<8x128xi1>, vector<8x128xf32>
      %64 = vector.shape_cast %63 : vector<8x128xf32> to vector<1x8x128xf32>
      %cst_37 = arith.constant dense<0x7F800000> : vector<1xf32>
      %65 = vector.multi_reduction <minimumf>, %64, %cst_37 [1, 2] : vector<1x8x128xf32> to vector<1xf32>
      %66 = vector.shape_cast %65 : vector<1xf32> to vector<1x1x1xf32>
      %67 = vector.extract %66[0, 0, 0] : f32 from vector<1x1x1xf32>
      %c0_38 = arith.constant 0 : index
      %68 = memref.load %arg9[%c0_38] : memref<1xf32, #tpu.memory_space<smem>>
      %69 = arith.minimumf %68, %67 : f32
      %c0_39 = arith.constant 0 : index
      %70 = memref.load %arg9[%c0_39] : memref<1xf32, #tpu.memory_space<smem>>
      memref.store %69, %arg9[%c0_39] : memref<1xf32, #tpu.memory_space<smem>>
    } else {
    }
    %c1_i32 = arith.constant 1 : i32
    %8 = arith.cmpi eq, %arg0, %c1_i32 : i32
    %9 = arith.extui %8 : i1 to i32
    %c0_i32_5 = arith.constant 0 : i32
    %10 = arith.cmpi ne, %9, %c0_i32_5 : i32
    scf.if %10 {
      %11 = arith.index_cast %arg1 : i32 to index
      %c0 = arith.constant 0 : index
      %c0_6 = arith.constant 0 : index
      %12 = vector.load %arg8[%11, %c0, %c0_6] : memref<1x8x128xf32, #tpu.memory_space<vmem>>, vector<1x8x128xf32>
      %13 = vector.shape_cast %12 : vector<1x8x128xf32> to vector<8x128xf32>
      %c0_7 = arith.constant 0 : index
      %14 = memref.load %arg9[%c0_7] : memref<1xf32, #tpu.memory_space<smem>>
      %15 = vector.broadcast %14 : f32 to vector<8x128xf32>
      %16 = arith.subf %13, %15 : vector<8x128xf32>
      %cst_8 = arith.constant 1.000000e+00 : f32
      %17 = vector.broadcast %cst_8 : f32 to vector<8x128xf32>
      %18 = arith.addf %16, %17 : vector<8x128xf32>
      %c0_9 = arith.constant 0 : index
      %c0_10 = arith.constant 0 : index
      %19 = vector.load %arg6[%c0_9, %c0_10] : memref<8x128xf32, #tpu.memory_space<vmem>>, vector<8x128xf32>
      %20 = arith.mulf %18, %19 : vector<8x128xf32>
      %c0_11 = arith.constant 0 : index
      %c0_12 = arith.constant 0 : index
      %21 = vector.load %arg7[%c0_11, %c0_12] : memref<8x128xf32, #tpu.memory_space<vmem>>, vector<8x128xf32>
      tpu.vector_store %arg7[%c0_11, %c0_12], %20 {strides = array<i32>} : memref<8x128xf32, #tpu.memory_space<vmem>>, vector<8x128xf32>,
    } else {
    }
    return
  }
  func.func @transform_0(%arg0: i32, %arg1: i32) -> (i32, i32) {
    %c1_i32 = arith.constant 1 : i32
    %0 = arith.subi %c1_i32, %arg0 : i32
    %1 = arith.muli %arg1, %0 : i32
    %c0_i32 = arith.constant 0 : i32
    %c0_i32_0 = arith.constant 0 : i32
    return %1, %c0_i32 : i32, i32
  }
  func.func @transform_1(%arg0: i32, %arg1: i32) -> (i32, i32) {
    %c0_i32 = arith.constant 0 : i32
    %c0_i32_0 = arith.constant 0 : i32
    %c0_i32_1 = arith.constant 0 : i32
    return %c0_i32, %c0_i32_0 : i32, i32
  }
  func.func @transform_2(%arg0: i32, %arg1: i32) -> (i32, i32, i32) {
    %c0_i32 = arith.constant 0 : i32
    %c0_i32_0 = arith.constant 0 : i32
    %c0_i32_1 = arith.constant 0 : i32
    %c0_i32_2 = arith.constant 0 : i32
    return %c0_i32, %c0_i32_0, %c0_i32_1 : i32, i32, i32
  }
  func.func @transform_3(%arg0: i32, %arg1: i32) -> (i32, i32, i32) {
    %c0_i32 = arith.constant 0 : i32
    %c0_i32_0 = arith.constant 0 : i32
    %c0_i32_1 = arith.constant 0 : i32
    %c0_i32_2 = arith.constant 0 : i32
    return %c0_i32, %c0_i32_0, %c0_i32_1 : i32, i32, i32
  }
  func.func @transform_4(%arg0: i32, %arg1: i32) -> (i32, i32) {
    %0 = arith.muli %arg1, %arg0 : i32
    %c0_i32 = arith.constant 0 : i32
    %c0_i32_0 = arith.constant 0 : i32
    return %0, %c0_i32 : i32, i32
  }
  func.func @transform_5(%arg0: i32, %arg1: i32) -> (i32, i32) {
    %0 = arith.muli %arg1, %arg0 : i32
    %c0_i32 = arith.constant 0 : i32
    %c0_i32_0 = arith.constant 0 : i32
    return %0, %c0_i32 : i32, i32
  }
}

</mosaic_0001>

<bundles_post_ra>
// kernel: network_forward.1
= control target key start
LH: loop header
LB: loop body
LE: loop exit
PB: predicated region body
PF: predicated region fallthrough
CT: control target
= control target key end

     0   :  { %10 = vsyncpa [#allocation5], 0  ;;  %s1434_s0 = inlined_call_operand.vmem [shape: bf16[8,128], index: 0, kind: input, shape index: {}]   ;;  %s1435_s1 = inlined_call_operand.hbm [shape: bf16[128,128], index: 1, kind: input, shape index: {}]   ;;  %s1436_s2 = inlined_call_operand.hbm [shape: bf16[3,128,128], index: 2, kind: input, shape index: {}]   ;;  %s1437_s3 = inlined_call_operand.vmem [shape: f32[4,1,128], index: 3, kind: input, shape index: {}]   ;;  %s1438_s4 = inlined_call_operand.vmem [shape: f32[8,128], index: 4, kind: input, shape index: {}]   ;;  %s1439_s5 = inlined_call_operand.vmem [shape: f32[8,128], index: 5, kind: output, shape index: {}]  }
   0x1   :  { %11 = vsyncpa [#allocation7], 0  ;;  %s1296_s18 = smov 0   ;;  %s1298_s19 = smov 0  }
   0x2   :  { %s1300_s20 = smov 0  }
   0x3 LB: > { %s916_s21 = sadd.s32 4294967295, %s1257_s20   ;;  %s29_s22 = sadd.s32 1, %s1253_s19  ;;  %s1257_s20 = sphi %s1300_s20, %s17_s20   ;;  %s1253_s19 = sphi %s1298_s19, %s1444_s19   ;;  %s1249_s18 = sphi %s1296_s18, %s1443_s18  }
   0x4   : > { %p31_p0 = scmp.ge.s32.totalorder %s29_s22, 2  ;;  %p918_p1 = scmp.ge.s32.totalorder %s1257_s20, 1 }
   0x5   : > { %p183_p2 = scmp.lt.s32.totalorder %s1257_s20, 3  ;;  %p1321_p4 = scmp.eq.s32.totalorder %s916_s21, 0 }
   0x6   : > { %s1446_s22 = smov (%p31_p0, %s29_s22), 0  ;;  %s1259_s25 = smov [#allocation4]  }
   0x7   : > { %p1317_p3 = pnand %p918_p1, %p183_p2  ;;  %s195_s26 = sshll.u32 %s1259_s25, 4  ;;  %s196_s26 = int_to_ptr.vmem [resolvable:$true] %s195_s26 }
   0x8   : > { %s1260_s28 = smov [#allocation6]   ;;  %s1186_s30 = scalar_lea.vmem %s196_s26, 1024 }
   0x9   : > { %p1101_p5 = pneg %p1317_p3  ;;  %s208_s29 = sshll.u32 %s1260_s28, 4  ;;  %s209_s29 = int_to_ptr.vmem [resolvable:$true] %s208_s29 }
   0xa   : > { %p1187_p8 = scmp.ne.s32.totalorder %s196_s26, %s1186_s30  ;;  %p1194_p11 = scmp.lt.s32.totalorder %s196_s26, %s196_s26 }
   0xb   : > { %p1329_p6 = pnand %p1321_p4, %p1101_p5  ;;  %p1195_p12 = scmp.lt.s32.totalorder %s1186_s30, %s1186_s30 }
   0xd   : > { %p1177_p7 = pneg %p1329_p6  ;;  %p1196_p13 = por %p1195_p12, %p1194_p11 }
   0xf   : > { %p1189_p9 = pnand %p1187_p8, %p1177_p7 }
  0x11   : > { %p1190_p10 = pneg %p1189_p9 }
  0x13   : > { %p1197_p0 = pnand %p1196_p13, %p1190_p10 }
  0x15   : > { %1200 = shalt.err (!%p1197_p0)
}
  0x16   : > { %s1261_s6 = smov 64   ;;  %s1262_s7 = smov 4  }
  0x17   : > { %1104 = dma.hbm_to_vmem [thread:$0]  (!%p1329_p6), %s1435_s1, 1024, %s196_s26, [#allocation5], %s1261_s6, %s1261_s6, %s1262_s7  }
  0x18   : > { %s1212_s10 = scalar_lea.vmem %s209_s29, 3072  ;;  %p1220_p8 = scmp.lt.s32.totalorder %s209_s29, %s209_s29 }
  0x19   : > { %p1213_p1 = scmp.ne.s32.totalorder %s209_s29, %s1212_s10  ;;  %p1221_p9 = scmp.lt.s32.totalorder %s1212_s10, %s1212_s10 }
  0x1b   : > { %p1215_p2 = pnand %p1213_p1, %p1177_p7  ;;  %p1222_p11 = por %p1221_p9, %p1220_p8 }
  0x1d   : > { %p1216_p5 = pneg %p1215_p2 }
  0x1f   : > { %p1223_p10 = pnand %p1222_p11, %p1216_p5 }
  0x21   : > { %1226 = shalt.err (!%p1223_p10)
}
  0x22   : > { %1107 = dma.hbm_to_vmem [thread:$0]  (!%p1329_p6), %s1436_s2, 3072, %s209_s29, [#allocation7], %s1261_s6, %s1261_s6, %s1262_s7  }
  0x23   : > { %247 = sbr.rel (%p1317_p3) target bundleno = 1094 (0x446), region = 40 }
  0x28   : > { %1240 = dma.done.wait (%p1321_p4), [#allocation5], 1024  }
  0x29   : > { %1242 = vsyncadd (%p1321_p4), [#allocation5], 4294966272 }
  0x2a   : > { %1244 = dma.done.wait (%p1321_p4), [#allocation7], 3072  }
  0x2b   : > { %1246 = vsyncadd (%p1321_p4), [#allocation7], 4294964224  ;;  %p306_p7 = scmp.eq.s32.totalorder %s1249_s18, 0  ;;  %s1263_s13 = smov 3e+38  }
  0x2c   : > { %p928_p6 = scmp.ne.s32.totalorder %s1249_s18, 0 }
  0x2d   : > { %1100 = sst [smem:[#allocation3]] (%p306_p7), %s1263_s13 }
  0x2e   : > { %316 = sbr.rel (%p928_p6) target bundleno = 1079 (0x437), region = 56  ;;  %s795_s28 = sld [smem:[#allocation3]] (!%p928_p6) }
  0x33   : > { %v1143_v0 = vld [vmem:[#allocation4 + $0x38] sm:$0xff]   ;;  %v1264_v1 = vmov 0.0   ;;  %v1144_v2 = vld [vmem:[#allocation4 + $0x30] sm:$0xff]   ;;  %vm1265_vm0 = vmmov 0   ;;  %v1145_v3 = vld [vmem:[#allocation4 + $0x28] sm:$0xff]   ;;  %v776_v58 = vlaneseq }
  0x34   : > { %1010 = vmatprep.subr.bf16.mxu0 %v1264_v1  ;;  %1030 = vmatprep.subr.bf16.mxu1 %v1264_v1  ;;  %v1151_v4 = vld [vmem:[#allocation6 + $0x38] sm:$0xff]   ;;  %v1146_v5 = vld [vmem:[#allocation4 + $0x20] sm:$0xff]   ;;  %v1152_v6 = vld [vmem:[#allocation6 + $0x30] sm:$0xff]  }
  0x35   : > { %1011 = vmatpush3.bf16.msra.mxu0 %v1143_v0  ;;  %1026 = vmatprep.mubr.msk.bf16.mxu0 %vm1265_vm0, %v1264_v1  ;;  %v1147_v7 = vld [vmem:[#allocation4 + $0x18] sm:$0xff]   ;;  %v1153_v8 = vld [vmem:[#allocation6 + $0x28] sm:$0xff]   ;;  %v1148_v9 = vld [vmem:[#allocation4 + $0x10] sm:$0xff]   ;;  %v777_v59 = vshrl.u32 %v776_v58, 7  ;;  %v781_v60 = vand.u32 127, %v776_v58 }
  0x36   : > { %1012 = vmatprep.subr.bf16.mxu0 %v1264_v1  ;;  %1046 = vmatprep.mubr.msk.bf16.mxu1 %vm1265_vm0, %v1264_v1  ;;  %v1154_v10 = vld [vmem:[#allocation6 + $0x20] sm:$0xff]   ;;  %v1149_v11 = vld [vmem:[#allocation4 + $0x8] sm:$0xff]   ;;  %v1155_v12 = vld [vmem:[#allocation6 + $0x18] sm:$0xff]  }
  0x37   : > { %1031 = vmatpush3.bf16.msra.mxu1 %v1151_v4  ;;  %v1150_v13 = vld [vmem:[#allocation4] sm:$0xff]   ;;  %v1156_v14 = vld [vmem:[#allocation6 + $0x10] sm:$0xff]   ;;  %v317_v15 = vld [vmem:[%s1434_s0] sm:$0xf]  ;;  %vm782_vm1 = vcmp.lt.s32.totalorder %v777_v59, 2  ;;  %vm783_vm2 = vcmp.lt.s32.totalorder %v781_v60, 8 }
  0x38   : > { %1032 = vmatprep.subr.bf16.mxu1 %v1264_v1  ;;  %v1157_v16 = vld [vmem:[#allocation6 + $0x8] sm:$0xff]   ;;  %v1158_v17 = vld [vmem:[#allocation6] sm:$0xff]   ;;  %v1159_v18 = vld [vmem:[#allocation6 + $0x78] sm:$0xff]  }
  0x39   : > { %1013 = vmatpush3.bf16.msra.mxu0 %v1144_v2  ;;  %v1160_v19 = vld [vmem:[#allocation6 + $0x70] sm:$0xff]   ;;  %v1161_v20 = vld [vmem:[#allocation6 + $0x68] sm:$0xff]   ;;  %v1162_v21 = vld [vmem:[#allocation6 + $0x60] sm:$0xff]  }
  0x3a   : > { %1014 = vmatprep.subr.bf16.mxu0 %v1264_v1  ;;  %v1163_v22 = vld [vmem:[#allocation6 + $0x58] sm:$0xff]   ;;  %v1164_v23 = vld [vmem:[#allocation6 + $0x50] sm:$0xff]   ;;  %v1165_v32 = vld [vmem:[#allocation6 + $0x48] sm:$0xff]  }
  0x3b   : > { %1033 = vmatpush3.bf16.msra.mxu1 %v1152_v6  ;;  %v929_v24 = vld [vmem:[%s1437_s3] ss:$0 sm:$0xff]  ;;  %v1166_v33 = vld [vmem:[#allocation6 + $0x40] sm:$0xff]   ;;  %v1168_v35 = vld [vmem:[#allocation6 + $0xb0] sm:$0xff]  }
  0x3c   : > { %1034 = vmatprep.subr.bf16.mxu1 %v1264_v1  ;;  %v1167_v34 = vld [vmem:[#allocation6 + $0xb8] sm:$0xff]   ;;  %v1169_v36 = vld [vmem:[#allocation6 + $0xa8] sm:$0xff]   ;;  %v1170_v37 = vld [vmem:[#allocation6 + $0xa0] sm:$0xff]  }
  0x3d   : > { %1015 = vmatpush3.bf16.msra.mxu0 %v1145_v3  ;;  %v1171_v38 = vld [vmem:[#allocation6 + $0x98] sm:$0xff]   ;;  %v1172_v39 = vld [vmem:[#allocation6 + $0x90] sm:$0xff]   ;;  %v1173_v48 = vld [vmem:[#allocation6 + $0x88] sm:$0xff]  }
  0x3e   : > { %1016 = vmatprep.subr.bf16.mxu0 %v1264_v1  ;;  %v939_v40 = vld [vmem:[%s1437_s3 + $0x1] ss:$0 sm:$0xff]  ;;  %v1174_v49 = vld [vmem:[#allocation6 + $0x80] sm:$0xff]   ;;  %v949_v50 = vld [vmem:[%s1437_s3 + $0x2] ss:$0 sm:$0xff] }
  0x3f   : > { %1035 = vmatpush3.bf16.msra.mxu1 %v1153_v8  ;;  %v959_v61 = vld [vmem:[%s1437_s3 + $0x3] ss:$0 sm:$0xff]  ;;  %vm784_vm3 = vmand %vm782_vm1, %vm783_vm2 }
  0x40   : > { %1036 = vmatprep.subr.bf16.mxu1 %v1264_v1 }
  0x41   : > { %1017 = vmatpush3.bf16.msra.mxu0 %v1146_v5 }
  0x42   : > { %1018 = vmatprep.subr.bf16.mxu0 %v1264_v1 }
  0x43   : > { %1037 = vmatpush3.bf16.msra.mxu1 %v1154_v10 }
  0x44   : > { %1038 = vmatprep.subr.bf16.mxu1 %v1264_v1 }
  0x45   : > { %1019 = vmatpush3.bf16.msra.mxu0 %v1147_v7 }
  0x46   : > { %1020 = vmatprep.subr.bf16.mxu0 %v1264_v1 }
  0x47   : > { %1039 = vmatpush3.bf16.msra.mxu1 %v1155_v12 }
  0x48   : > { %1040 = vmatprep.subr.bf16.mxu1 %v1264_v1 }
  0x49   : > { %1021 = vmatpush3.bf16.msra.mxu0 %v1148_v9 }
  0x4a   : > { %1022 = vmatprep.subr.bf16.mxu0 %v1264_v1 }
  0x4b   : > { %1041 = vmatpush3.bf16.msra.mxu1 %v1156_v14 }
  0x4c   : > { %1042 = vmatprep.subr.bf16.mxu1 %v1264_v1 }
  0x4d   : > { %1023 = vmatpush3.bf16.msra.mxu0 %v1149_v11 }
  0x4e   : > { %1024 = vmatprep.subr.bf16.mxu0 %v1264_v1 }
  0x4f   : > { %1043 = vmatpush3.bf16.msra.mxu1 %v1157_v16 }
  0x50   : > { %1044 = vmatprep.subr.bf16.mxu1 %v1264_v1 }
  0x51   : > { %1025 = vmatpush3.bf16.msra.mxu0 %v1150_v13 }
  0x52   : > { %1050 = vmatprep.subr.bf16.mxu0 %v1264_v1 }
  0x53   : > { %1045 = vmatpush3.bf16.msra.mxu1 %v1158_v17 }
  0x54   : > { %1027 = vmatmul.mubr.bf16.vlgmr.msra.gmra.mxu0 %v317_v15  ;;  %1070 = vmatprep.subr.bf16.mxu1 %v1264_v1 }
  0x55   : > { %1066 = vmatprep.mubr.msk.bf16.mxu0 %vm1265_vm0, %v1264_v1  ;;  %1051 = vmatpush3.bf16.msra.mxu0 %v1159_v18 }
  0x56   : > { %1052 = vmatprep.subr.bf16.mxu0 %v1264_v1 }
  0x59   : > { %1053 = vmatpush3.bf16.msra.mxu0 %v1160_v19 }
  0x5a   : > { %1054 = vmatprep.subr.bf16.mxu0 %v1264_v1 }
  0x5d   : > { %1055 = vmatpush3.bf16.msra.mxu0 %v1161_v20 }
  0x5e   : > { %1056 = vmatprep.subr.bf16.mxu0 %v1264_v1 }
  0x61   : > { %1057 = vmatpush3.bf16.msra.mxu0 %v1162_v21 }
  0x62   : > { %1058 = vmatprep.subr.bf16.mxu0 %v1264_v1 }
  0x65   : > { %1059 = vmatpush3.bf16.msra.mxu0 %v1163_v22 }
  0x66   : > { %1060 = vmatprep.subr.bf16.mxu0 %v1264_v1 }
  0x69   : > { %1061 = vmatpush3.bf16.msra.mxu0 %v1164_v23 }
  0x6a   : > { %1062 = vmatprep.subr.bf16.mxu0 %v1264_v1 }
  0x6d   : > { %1063 = vmatpush3.bf16.msra.mxu0 %v1165_v32 }
  0x6e   : > { %1064 = vmatprep.subr.bf16.mxu0 %v1264_v1 }
  0x71   : > { %1065 = vmatpush3.bf16.msra.mxu0 %v1166_v33 }
 0x114   : > { %v423_v25 = vpop.f32.mrf.mxu0 }
 0x115   : > { %v424_v26 = vadd.f32 %v929_v24, %v423_v25 }
 0x116   : > { %v1028_v27 = vpop.f32.mrf.mxu0 }
 0x117   : > { %v429_v28 = vmax.f32 %v424_v26, 0.0 }
 0x118   : > { %v426_v29 = vpop.f32.mrf.mxu0 }
 0x119   : > { %v430_v30 = vpack.c.bf16 %v429_v28, %v429_v28 }
 0x11a   : > { %v1029_v31 = vpop.f32.mrf.mxu0 }
 0x11b   : > { %1047 = vmatmul.mubr.bf16.vlgmr.msra.gmra.mxu1 %v430_v30 }
 0x11c   : > { %1086 = vmatprep.mubr.msk.bf16.mxu1 %vm1265_vm0, %v1264_v1  ;;  %1071 = vmatpush3.bf16.msra.mxu1 %v1167_v34 }
 0x11d   : > { %1072 = vmatprep.subr.bf16.mxu1 %v1264_v1 }
 0x120   : > { %1073 = vmatpush3.bf16.msra.mxu1 %v1168_v35 }
 0x121   : > { %1074 = vmatprep.subr.bf16.mxu1 %v1264_v1 }
 0x124   : > { %1075 = vmatpush3.bf16.msra.mxu1 %v1169_v36 }
 0x125   : > { %1076 = vmatprep.subr.bf16.mxu1 %v1264_v1 }
 0x128   : > { %1077 = vmatpush3.bf16.msra.mxu1 %v1170_v37 }
 0x129   : > { %1078 = vmatprep.subr.bf16.mxu1 %v1264_v1 }
 0x12c   : > { %1079 = vmatpush3.bf16.msra.mxu1 %v1171_v38 }
 0x12d   : > { %1080 = vmatprep.subr.bf16.mxu1 %v1264_v1 }
 0x130   : > { %1081 = vmatpush3.bf16.msra.mxu1 %v1172_v39 }
 0x131   : > { %1082 = vmatprep.subr.bf16.mxu1 %v1264_v1 }
 0x134   : > { %1083 = vmatpush3.bf16.msra.mxu1 %v1173_v48 }
 0x135   : > { %1084 = vmatprep.subr.bf16.mxu1 %v1264_v1 }
 0x138   : > { %1085 = vmatpush3.bf16.msra.mxu1 %v1174_v49 }
 0x1db   : > { %v537_v41 = vpop.f32.mrf.mxu1 }
 0x1dc   : > { %v538_v42 = vadd.f32 %v939_v40, %v537_v41 }
 0x1dd   : > { %v1048_v43 = vpop.f32.mrf.mxu1 }
 0x1de   : > { %v543_v44 = vmax.f32 %v538_v42, 0.0 }
 0x1df   : > { %v540_v45 = vpop.f32.mrf.mxu1 }
 0x1e0   : > { %v544_v46 = vpack.c.bf16 %v543_v44, %v543_v44 }
 0x1e1   : > { %v1049_v47 = vpop.f32.mrf.mxu1 }
 0x1e2   : > { %1067 = vmatmul.mubr.bf16.vlgmr.msra.gmra.mxu0 %v544_v46 }
 0x2a2   : > { %v652_v51 = vpop.f32.mrf.mxu0 }
 0x2a3   : > { %v653_v52 = vadd.f32 %v949_v50, %v652_v51 }
 0x2a4   : > { %v1068_v53 = vpop.f32.mrf.mxu0 }
 0x2a5   : > { %v658_v54 = vmax.f32 %v653_v52, 0.0 }
 0x2a6   : > { %v655_v55 = vpop.f32.mrf.mxu0 }
 0x2a7   : > { %v659_v56 = vpack.c.bf16 %v658_v54, %v658_v54 }
 0x2a8   : > { %v1069_v57 = vpop.f32.mrf.mxu0 }
 0x2a9   : > { %1087 = vmatmul.mubr.bf16.vlgmr.msra.gmra.mxu1 %v659_v56 }
 0x369   : > { %v767_v62 = vpop.f32.mrf.mxu1 }
 0x36a   : > { %v768_v63 = vadd.f32 %v959_v61, %v767_v62 }
 0x36b   : > { %v1088_v0 = vpop.f32.mrf.mxu1 }
 0x36c   : > { %775 = vst [vmem:[#allocation2] sm:$0xff] %v768_v63  ;;  %v785_v1 = vsel %vm784_vm3, %v768_v63, 3e+38 }
 0x36d   : > { %v770_v2 = vpop.f32.mrf.mxu1  ;;  %786 = vmin.xlane.f32.xlu0 %v785_v1 }
 0x36f   : > { %v1089_v3 = vpop.f32.mrf.mxu1 }
 0x3f6   : > { %v787_v4 = vpop.xlane.xlu0 %786 }
 0x3f7   : > { %v788_v5 = vrot.slane %v787_v4, 4 }
 0x3f9   : > { %v789_v6 = vmin.f32 %v787_v4, %v788_v5 }
 0x3fb   : > { %v790_v7 = vrot.slane %v789_v6, 2 }
 0x3fd   : > { %v791_v8 = vmin.f32 %v789_v6, %v790_v7 }
 0x3ff   : > { %v792_v9 = vrot.slane %v791_v8, 1 }
 0x401   : > { %v793_v10 = vmin.f32 %v791_v8, %v792_v9 }
 0x403   : > { %1090 = vpush %v793_v10 }
 0x434   : > { %s1091_s29 = spop %1090 }
 0x435   : > { %s796_s30 = smin.f32 %s1091_s29, %s795_s28 }
 0x436   : > { %798 = sst [smem:[#allocation3]] %s796_s30 }
 0x437 PF: > { %p968_p3 = scmp.ne.s32.totalorder %s1249_s18, 1 }
 0x438   : > { %s806_s6 = sld [smem:[#allocation3]] (!%p968_p3) }
 0x439   : > { %802 = sbr.rel (%p968_p3) target bundleno = 1094 (0x446), region = 60 }
 0x43e   : > { %v805_v11 = vld [vmem:[#allocation2] sm:$0xff]  ;;  %v807_v12 = vstv %s806_s6 }
 0x43f   : > { %v808_v13 = vsub.f32 %v805_v11, %v807_v12  ;;  %v810_v14 = vld [vmem:[%s1438_s4] sm:$0xff] }
 0x441   : > { %v809_v15 = vadd.f32 1.0, %v808_v13 }
 0x443   : > { %v811_v16 = vmul.f32 %v810_v14, %v809_v15 }
 0x445   : > { %812 = vst [vmem:[%s1439_s5] sm:$0xff] %v811_v16 }
 0x446 PF: > { %s17_s20 = sadd.s32 1, %s1257_s20   ;;  %s1443_s18 = smov %s1253_s19 }
 0x447   : > { %p14_p4 = scmp.ge.s32.totalorder %s17_s20, 4   ;;  %s1444_s19 = smov %s1446_s22 }
 0x449   :  { %16 = sbr.rel (!%p14_p4) target bundleno = 3 (0x3), region = 103 }
 0x44e   :  { %835 = vsyncpa [#allocation5], 1 }
 0x44f   :  { %837 = vsyncpa [#allocation5 + $0x1], 1 }
 0x450   :  { %838 = vsyncpa [#allocation7], 1 }

</bundles_post_ra>
